<compile_context>
chip_gen: v6e
topology: v6e:2x2x1
jax: 0.10.0
libtpu: 0.0.40
codegen_flags: <defaults>
</compile_context>

<pallas_src>
import functools

import jax
import jax.numpy as jnp
import numpy as np
from jax.experimental import pallas as pl
from jax.experimental.pallas import tpu as pltpu


def _round_up(x, m):
    return ((x + m - 1) // m) * m


# ----------------------------------------------------------------------------
# Fused kernel: layer 0 as one lane-dense matmul, layers 1 & 2 over the band.
# ----------------------------------------------------------------------------
def _fused_mlp_kernel(x_ref, w0_ref, b0_ref, w1_ref, b1_ref, w2_ref, b2_ref,
                      o_ref):
    n_tiles, TK, _ = w1_ref.shape
    MT = w2_ref.shape[2]
    wdt = w0_ref.dtype                                            # bf16 weights

    # Layer 0: one matmul covers all D MLPs (masking + probe baked into W0p/b0p).
    x = x_ref[...].astype(wdt)                                    # (TB, D)
    h0 = jnp.dot(x, w0_ref[...], preferred_element_type=jnp.float32) + b0_ref[...]
    h0 = jnp.maximum(h0, 0.0)                                     # (TB, DHp) f32

    # Zero-init the lane-dense (128-multiple) output block; the padded tail
    # beyond n_tiles*MT stays zero and is sliced off by the wrapper.
    o_ref[...] = jnp.zeros(o_ref.shape, o_ref.dtype)

    # Layers 1 & 2: static (fully unrolled) loop over diagonal band tiles.
    for t in range(n_tiles):
        lo, hi = t * TK, (t + 1) * TK
        h1 = jnp.dot(h0[:, lo:hi].astype(wdt), w1_ref[t],
                     preferred_element_type=jnp.float32) + b1_ref[:, lo:hi]
        h1 = jnp.maximum(h1, 0.0)                                 # (TB, TK) f32
        y = jnp.dot(h1.astype(wdt), w2_ref[t],
                    preferred_element_type=jnp.float32) + b2_ref[:, t * MT:(t + 1) * MT]
        o_ref[:, t * MT:(t + 1) * MT] = y.astype(o_ref.dtype)     # per-MLP contiguous


# ----------------------------------------------------------------------------
# Wrapper: batch grid, resident weights, VMEM budget, output interleave.
# ----------------------------------------------------------------------------
@functools.partial(jax.jit, static_argnames=("M",))
def mlp_list_forward(inputs, W0p, b0p, W1band, b1p, W2band, b2c, *, M):
    """inputs: (B, D) float32 -> (B, D*M) float32 matching MLPList.forward."""
    B, D = inputs.shape
    n_tiles, TK, _ = W1band.shape
    MT = W2band.shape[2]
    DHp = n_tiles * TK
    Noutp = b2c.shape[1]

    # Batch tile: 8-row (f32 sublane) granularity, capped at 256 (MXU height on
    # v6e/v7x; on v5e 128 would match its 128-wide MXU — 256 is still correct).
    TB = min(256, _round_up(B, 8))
    Bp = _round_up(B, TB)
    x = jnp.zeros((Bp, D), jnp.float32).at[:B, :].set(inputs.astype(jnp.float32))

    # Scoped-VMEM budget: weights + biases + activations, x2 for double-buffered
    # block slots, +30% headroom, clamped to [32 MiB default, 64 MiB v7x physical].
    wsz = W1band.dtype.itemsize
    weights = (D * DHp + n_tiles * TK * TK + n_tiles * TK * _round_up(MT, 128)) * wsz
    biases = (2 * 8 * DHp + 8 * Noutp) * 4          # (1,N) refs pad to 8 sublanes
    acts = (TB * _round_up(D, 128) + TB * Noutp) * 4
    interm = 3 * TB * DHp * 4
    est = 2 * (weights + biases + acts) + interm
    vmem_limit = int(min(max(est * 13 // 10, 32 * 1024 * 1024), 64 * 1024 * 1024))
    # TODO(synk): if the packed band weights alone exceed ~56 MiB (v7x 64 MiB VMEM),
    # keep W1band/W2band in HBM (memory_space=pl.ANY) and double-buffer band tiles
    # in the kernel with pltpu.make_async_copy instead of resident BlockSpecs.

    out = pl.pallas_call(
        _fused_mlp_kernel,
        out_shape=jax.ShapeDtypeStruct((Bp, Noutp), jnp.float32),
        grid=(Bp // TB,),
        in_specs=[
            pl.BlockSpec((TB, D), lambda b: (b, 0)),               # x: batch-tiled
            pl.BlockSpec((D, DHp), lambda b: (0, 0)),              # weights resident
            pl.BlockSpec((1, DHp), lambda b: (0, 0)),
            pl.BlockSpec((n_tiles, TK, TK), lambda b: (0, 0, 0)),  # W1 diagonal band
            pl.BlockSpec((1, DHp), lambda b: (0, 0)),
            pl.BlockSpec((n_tiles, TK, MT), lambda b: (0, 0, 0)),  # W2 compact band
            pl.BlockSpec((1, Noutp), lambda b: (0, 0)),
        ],
        out_specs=pl.BlockSpec((TB, Noutp), lambda b: (b, 0)),
        compiler_params=pltpu.CompilerParams(
            dimension_semantics=("parallel",),   # batch tiles split across TCs (v7x)
            vmem_limit_bytes=vmem_limit,
        ),
    )(x, W0p, b0p, W1band, b1p, W2band, b2c)

    contig = out[:B, : D * M]                     # (B, D*M), column i*M + m per MLP i
    # Interleave to the module's layout: outputs[:, m*D + i] = y_i[:, m].
    return contig.reshape(B, D, M).transpose(0, 2, 1).reshape(B, D * M)


# ----------------------------------------------------------------------------
# Deterministic per-MLP parameter construction (mirrors nn.Linear init shapes)
# ----------------------------------------------------------------------------
def init_mlp_list_params(key, D, M, H):
    """Returns a list of per-MLP raw float32 params [(w0, b0, w1, b1, w2, b2), ...]."""
    raw = []
    for i in range(D):
        dim = 10 if i == 0 else i               # ndep == 0 -> dim = 10, else ndep = i
        key, *ks = jax.random.split(key, 7)
        bnd0 = 1.0 / np.sqrt(dim)
        bnd1 = 1.0 / np.sqrt(H)
        w0 = np.asarray(jax.random.uniform(ks[0], (dim, H), jnp.float32, -bnd0, bnd0))
        b0 = np.asarray(jax.random.uniform(ks[1], (H,), jnp.float32, -bnd0, bnd0))
        w1 = np.asarray(jax.random.uniform(ks[2], (H, H), jnp.float32, -bnd1, bnd1))
        b1 = np.asarray(jax.random.uniform(ks[3], (H,), jnp.float32, -bnd1, bnd1))
        w2 = np.asarray(jax.random.uniform(ks[4], (H, M), jnp.float32, -bnd1, bnd1))
        b2 = np.asarray(jax.random.uniform(ks[5], (M,), jnp.float32, -bnd1, bnd1))
        raw.append((w0, b0, w1, b1, w2, b2))
    return raw


def pack_params(raw, D, M, H, weight_dtype=jnp.bfloat16):
    """Pack per-MLP params into band / lane-dense matrices for the fused kernel.

    - W0p[:i, i*H:(i+1)*H] = w0_i  (rows >= i zero -> implements inputs[:, :i]);
      MLP 0's fixed probe is folded into its layer-0 bias in f32.
    - W1band[t] holds the H x H diagonal blocks of the TK/H MLPs in band tile t.
    - W2band[t] keeps only the H live rows per MLP; output columns are
      per-MLP-contiguous (column i*M + m) — the m*D+i interleave lives in the wrapper.
    - Weights are bf16, biases f32.
    """
    assert (128 % H == 0) or (H % 128 == 0), "band packing needs H | 128 or 128 | H"
    TK = 128 if 128 % H == 0 else H
    mlps_per_tile = TK // H
    DH = D * H
    DHp = _round_up(DH, TK)
    n_tiles = DHp // TK
    MT = mlps_per_tile * M
    Noutp = _round_up(n_tiles * MT, 128)

    probe = 0.1 * np.linspace(-5.0, 5.0, 10, dtype=np.float32)

    W0p = np.zeros((D, DHp), np.float32)
    b0p = np.zeros((1, DHp), np.float32)
    W1b = np.zeros((n_tiles, TK, TK), np.float32)
    b1p = np.zeros((1, DHp), np.float32)
    W2b = np.zeros((n_tiles, TK, MT), np.float32)
    b2c = np.zeros((1, Noutp), np.float32)

    for i, (w0, b0, w1, b1, w2, b2) in enumerate(raw):
        t, j = divmod(i, mlps_per_tile)
        lo = i * H
        if i == 0:
            b0p[0, lo:lo + H] = probe @ w0 + b0        # probe folded in, f32; W0 block stays 0
        else:
            W0p[:i, lo:lo + H] = w0
            b0p[0, lo:lo + H] = b0
        b1p[0, lo:lo + H] = b1
        W1b[t, j * H:(j + 1) * H, j * H:(j + 1) * H] = w1
        W2b[t, j * H:(j + 1) * H, j * M:(j + 1) * M] = w2
        b2c[0, i * M:(i + 1) * M] = b2

    return (jnp.asarray(W0p, weight_dtype), jnp.asarray(b0p),
            jnp.asarray(W1b, weight_dtype), jnp.asarray(b1p),
            jnp.asarray(W2b, weight_dtype), jnp.asarray(b2c))


# ----------------------------------------------------------------------------
# References
# ----------------------------------------------------------------------------
def reference_forward_emulated(inputs, raw, D, M):
    """Pure-JAX reference mirroring the kernel's numerics exactly:
    bf16 weights, bf16 activation casts before each matmul, f32 accumulation,
    f32 ReLUs, MLP-0 probe path computed in f32."""
    inputs = jnp.asarray(inputs, jnp.float32)
    B = inputs.shape[0]
    probe = 0.1 * np.linspace(-5.0, 5.0, 10, dtype=np.float32)
    cols = []
    for i, (w0, b0, w1, b1, w2, b2) in enumerate(raw):
        if i == 0:
            h0_row = np.maximum(probe @ w0 + b0, 0.0)           # f32 (matches bias fold)
            h0 = jnp.broadcast_to(jnp.asarray(h0_row, jnp.float32), (B, h0_row.shape[0]))
        else:
            xc = inputs[:, :i].astype(jnp.bfloat16)
            h0 = jnp.dot(xc, jnp.asarray(w0, jnp.bfloat16),
                         preferred_element_type=jnp.float32) + jnp.asarray(b0)
            h0 = jnp.maximum(h0, 0.0)
        h1 = jnp.dot(h0.astype(jnp.bfloat16), jnp.asarray(w1, jnp.bfloat16),
                     preferred_element_type=jnp.float32) + jnp.asarray(b1)
        h1 = jnp.maximum(h1, 0.0)
        y = jnp.dot(h1.astype(jnp.bfloat16), jnp.asarray(w2, jnp.bfloat16),
                    preferred_element_type=jnp.float32) + jnp.asarray(b2)
        cols.append(y)                                          # (B, M)
    y_all = jnp.stack(cols, axis=1)                             # (B, D, M)
    return jnp.transpose(y_all, (0, 2, 1)).reshape(B, D * M)    # outputs[:, m*D+i]


def reference_forward_f32(inputs, raw, D, M):
    """Pure-numpy f32 reference mirroring the PyTorch module loop."""
    inputs = np.asarray(inputs, np.float32)
    B = inputs.shape[0]
    out = np.zeros((B, D * M), np.float32)
    probe = 0.1 * np.linspace(-5.0, 5.0, 10, dtype=np.float32)
    for i, (w0, b0, w1, b1, w2, b2) in enumerate(raw):
        x = np.broadcast_to(probe, (B, 10)) if i == 0 else inputs[:, :i]
        h = np.maximum(x @ w0 + b0, 0.0)
        h = np.maximum(h @ w1 + b1, 0.0)
        y = h @ w2 + b2
        for m in range(M):
            out[:, m * D + i] = y[:, m]
    return out


if __name__ == "__main__":
    # Small, forward-consistent shapes: batch=4, input_dim=8, multiplier=2, hidden=32.
    B, D, M, H = 4, 8, 2, 32

    key = jax.random.PRNGKey(0)
    kx, kp = jax.random.split(key)
    inputs = jax.random.normal(kx, (B, D), jnp.float32)

    raw = init_mlp_list_params(kp, D, M, H)
    packed = pack_params(raw, D, M, H)

    out = mlp_list_forward(inputs, *packed, M=M)
    out = jax.block_until_ready(out)
    assert out.shape == (B, D * M)

    # Strict check vs a reference that applies identical bf16/f32 numerics.
    ref_emu = np.asarray(reference_forward_emulated(inputs, raw, D, M))
    np.testing.assert_allclose(np.asarray(out), ref_emu, rtol=1e-3, atol=1e-3)

    # Loose sanity check vs the full-f32 PyTorch-faithful reference.
    ref_f32 = reference_forward_f32(np.asarray(inputs), raw, D, M)
    np.testing.assert_allclose(np.asarray(out), ref_f32, rtol=5e-2, atol=5e-2)

    print("KERNEL_OK")
</pallas_src>

<mosaic_0001>
module attributes {stable_mosaic.version = 11 : i64} {
  func.func @_fused_mlp_kernel(%arg0: i32, %arg1: memref<8x8xf32, #tpu.memory_space<vmem>>, %arg2: memref<8x256xbf16, #tpu.memory_space<vmem>>, %arg3: memref<1x256xf32, #tpu.memory_space<vmem>>, %arg4: memref<2x128x128xbf16, #tpu.memory_space<vmem>>, %arg5: memref<1x256xf32, #tpu.memory_space<vmem>>, %arg6: memref<2x128x8xbf16, #tpu.memory_space<vmem>>, %arg7: memref<1x128xf32, #tpu.memory_space<vmem>>, %arg8: memref<8x128xf32, #tpu.memory_space<vmem>>) attributes {dimension_semantics = [#tpu.dimension_semantics<parallel>], iteration_bounds = array<i64: 1>, scalar_prefetch = 0 : i64, scratch_operands = 0 : i64, tpu.core_type = #tpu.core_type<tc>, window_params = [{transform_indices = @transform_0, window_bounds = array<i64: 8, 8>}, {pipeline_mode = #tpu.pipeline_mode<synchronous>, transform_indices = @transform_1, window_bounds = array<i64: 8, 256>}, {pipeline_mode = #tpu.pipeline_mode<synchronous>, transform_indices = @transform_2, window_bounds = array<i64: 1, 256>}, {pipeline_mode = #tpu.pipeline_mode<synchronous>, transform_indices = @transform_3, window_bounds = array<i64: 2, 128, 128>}, {pipeline_mode = #tpu.pipeline_mode<synchronous>, transform_indices = @transform_4, window_bounds = array<i64: 1, 256>}, {pipeline_mode = #tpu.pipeline_mode<synchronous>, transform_indices = @transform_5, window_bounds = array<i64: 2, 128, 8>}, {pipeline_mode = #tpu.pipeline_mode<synchronous>, transform_indices = @transform_6, window_bounds = array<i64: 1, 128>}, {transform_indices = @transform_7, window_bounds = array<i64: 8, 128>}]} {
    %c0 = arith.constant 0 : index
    %c0_0 = arith.constant 0 : index
    %0 = vector.load %arg1[%c0, %c0_0] : memref<8x8xf32, #tpu.memory_space<vmem>>, vector<8x8xf32>
    %1 = arith.truncf %0 : vector<8x8xf32> to vector<8x8xbf16>
    %c0_1 = arith.constant 0 : index
    %c0_2 = arith.constant 0 : index
    %2 = vector.load %arg2[%c0_1, %c0_2] : memref<8x256xbf16, #tpu.memory_space<vmem>>, vector<8x256xbf16>
    %cst = arith.constant dense<0.000000e+00> : vector<8x256xf32>
    %3 = tpu.matmul %1, %2, %cst {dimension_numbers = #tpu.dot_dimension_numbers<[1], [0], [0], [1], [0, 0, 1, 1], [], []>} : vector<8x8xbf16>, vector<8x256xbf16>, vector<8x256xf32> -> vector<8x256xf32>
    %c0_3 = arith.constant 0 : index
    %c0_4 = arith.constant 0 : index
    %4 = vector.load %arg3[%c0_3, %c0_4] : memref<1x256xf32, #tpu.memory_space<vmem>>, vector<1x256xf32>
    %5 = vector.broadcast %4 : vector<1x256xf32> to vector<8x256xf32>
    %6 = arith.addf %3, %5 : vector<8x256xf32>
    %cst_5 = arith.constant 0.000000e+00 : f32
    %7 = vector.broadcast %cst_5 : f32 to vector<8x256xf32>
    %8 = arith.maximumf %6, %7 : vector<8x256xf32>
    %cst_6 = arith.constant 0.000000e+00 : f32
    %9 = vector.broadcast %cst_6 : f32 to vector<8x128xf32>
    %c0_7 = arith.constant 0 : index
    %c0_8 = arith.constant 0 : index
    %10 = vector.load %arg8[%c0_7, %c0_8] : memref<8x128xf32, #tpu.memory_space<vmem>>, vector<8x128xf32>
    tpu.vector_store %arg8[%c0_7, %c0_8], %9 {strides = array<i32>} : memref<8x128xf32, #tpu.memory_space<vmem>>, vector<8x128xf32>,
    %11 = vector.extract_strided_slice %8 {offsets = [0, 0], sizes = [8, 128], strides = [1, 1]} : vector<8x256xf32> to vector<8x128xf32>
    %12 = arith.truncf %11 : vector<8x128xf32> to vector<8x128xbf16>
    %c0_9 = arith.constant 0 : index
    %c0_10 = arith.constant 0 : index
    %c0_11 = arith.constant 0 : index
    %13 = vector.load %arg4[%c0_9, %c0_10, %c0_11] : memref<2x128x128xbf16, #tpu.memory_space<vmem>>, vector<1x128x128xbf16>
    %14 = vector.shape_cast %13 : vector<1x128x128xbf16> to vector<128x128xbf16>
    %cst_12 = arith.constant dense<0.000000e+00> : vector<8x128xf32>
    %15 = tpu.matmul %12, %14, %cst_12 {dimension_numbers = #tpu.dot_dimension_numbers<[1], [0], [0], [1], [0, 0, 1, 1], [], []>} : vector<8x128xbf16>, vector<128x128xbf16>, vector<8x128xf32> -> vector<8x128xf32>
    %c0_13 = arith.constant 0 : index
    %c0_14 = arith.constant 0 : index
    %16 = vector.load %arg5[%c0_13, %c0_14] : memref<1x256xf32, #tpu.memory_space<vmem>>, vector<1x128xf32>
    %17 = vector.broadcast %16 : vector<1x128xf32> to vector<8x128xf32>
    %18 = arith.addf %15, %17 : vector<8x128xf32>
    %cst_15 = arith.constant 0.000000e+00 : f32
    %19 = vector.broadcast %cst_15 : f32 to vector<8x128xf32>
    %20 = arith.maximumf %18, %19 : vector<8x128xf32>
    %21 = arith.truncf %20 : vector<8x128xf32> to vector<8x128xbf16>
    %c0_16 = arith.constant 0 : index
    %c0_17 = arith.constant 0 : index
    %c0_18 = arith.constant 0 : index
    %22 = vector.load %arg6[%c0_16, %c0_17, %c0_18] : memref<2x128x8xbf16, #tpu.memory_space<vmem>>, vector<1x128x8xbf16>
    %23 = vector.shape_cast %22 : vector<1x128x8xbf16> to vector<128x8xbf16>
    %cst_19 = arith.constant dense<0.000000e+00> : vector<8x8xf32>
    %24 = tpu.matmul %21, %23, %cst_19 {dimension_numbers = #tpu.dot_dimension_numbers<[1], [0], [0], [1], [0, 0, 1, 1], [], []>} : vector<8x128xbf16>, vector<128x8xbf16>, vector<8x8xf32> -> vector<8x8xf32>
    %c0_20 = arith.constant 0 : index
    %c0_21 = arith.constant 0 : index
    %25 = vector.load %arg7[%c0_20, %c0_21] : memref<1x128xf32, #tpu.memory_space<vmem>>, vector<1x8xf32>
    %26 = vector.broadcast %25 : vector<1x8xf32> to vector<8x8xf32>
    %27 = arith.addf %24, %26 : vector<8x8xf32>
    %c0_22 = arith.constant 0 : index
    %c0_23 = arith.constant 0 : index
    %28 = vector.load %arg8[%c0_22, %c0_23] : memref<8x128xf32, #tpu.memory_space<vmem>>, vector<8x8xf32>
    tpu.vector_store %arg8[%c0_22, %c0_23], %27 {strides = array<i32>} : memref<8x128xf32, #tpu.memory_space<vmem>>, vector<8x8xf32>,
    %29 = vector.extract_strided_slice %8 {offsets = [0, 128], sizes = [8, 128], strides = [1, 1]} : vector<8x256xf32> to vector<8x128xf32>
    %30 = arith.truncf %29 : vector<8x128xf32> to vector<8x128xbf16>
    %c1 = arith.constant 1 : index
    %c0_24 = arith.constant 0 : index
    %c0_25 = arith.constant 0 : index
    %31 = vector.load %arg4[%c1, %c0_24, %c0_25] : memref<2x128x128xbf16, #tpu.memory_space<vmem>>, vector<1x128x128xbf16>
    %32 = vector.shape_cast %31 : vector<1x128x128xbf16> to vector<128x128xbf16>
    %cst_26 = arith.constant dense<0.000000e+00> : vector<8x128xf32>
    %33 = tpu.matmul %30, %32, %cst_26 {dimension_numbers = #tpu.dot_dimension_numbers<[1], [0], [0], [1], [0, 0, 1, 1], [], []>} : vector<8x128xbf16>, vector<128x128xbf16>, vector<8x128xf32> -> vector<8x128xf32>
    %c0_27 = arith.constant 0 : index
    %c128 = arith.constant 128 : index
    %34 = vector.load %arg5[%c0_27, %c128] : memref<1x256xf32, #tpu.memory_space<vmem>>, vector<1x128xf32>
    %35 = vector.broadcast %34 : vector<1x128xf32> to vector<8x128xf32>
    %36 = arith.addf %33, %35 : vector<8x128xf32>
    %cst_28 = arith.constant 0.000000e+00 : f32
    %37 = vector.broadcast %cst_28 : f32 to vector<8x128xf32>
    %38 = arith.maximumf %36, %37 : vector<8x128xf32>
    %39 = arith.truncf %38 : vector<8x128xf32> to vector<8x128xbf16>
    %c1_29 = arith.constant 1 : index
    %c0_30 = arith.constant 0 : index
    %c0_31 = arith.constant 0 : index
    %40 = vector.load %arg6[%c1_29, %c0_30, %c0_31] : memref<2x128x8xbf16, #tpu.memory_space<vmem>>, vector<1x128x8xbf16>
    %41 = vector.shape_cast %40 : vector<1x128x8xbf16> to vector<128x8xbf16>
    %cst_32 = arith.constant dense<0.000000e+00> : vector<8x8xf32>
    %42 = tpu.matmul %39, %41, %cst_32 {dimension_numbers = #tpu.dot_dimension_numbers<[1], [0], [0], [1], [0, 0, 1, 1], [], []>} : vector<8x128xbf16>, vector<128x8xbf16>, vector<8x8xf32> -> vector<8x8xf32>
    %c0_33 = arith.constant 0 : index
    %c8 = arith.constant 8 : index
    %43 = vector.load %arg7[%c0_33, %c8] : memref<1x128xf32, #tpu.memory_space<vmem>>, vector<1x8xf32>
    %44 = vector.broadcast %43 : vector<1x8xf32> to vector<8x8xf32>
    %45 = arith.addf %42, %44 : vector<8x8xf32>
    %c0_34 = arith.constant 0 : index
    %c8_35 = arith.constant 8 : index
    %46 = vector.load %arg8[%c0_34, %c8_35] : memref<8x128xf32, #tpu.memory_space<vmem>>, vector<8x8xf32>
    tpu.vector_store %arg8[%c0_34, %c8_35], %45 {strides = array<i32>} : memref<8x128xf32, #tpu.memory_space<vmem>>, vector<8x8xf32>,
    return
  }
  func.func @transform_0(%arg0: i32) -> (i32, i32) {
    %c0_i32 = arith.constant 0 : i32
    %c0_i32_0 = arith.constant 0 : i32
    return %arg0, %c0_i32 : i32, i32
  }
  func.func @transform_1(%arg0: i32) -> (i32, i32) {
    %c0_i32 = arith.constant 0 : i32
    %c0_i32_0 = arith.constant 0 : i32
    %c0_i32_1 = arith.constant 0 : i32
    return %c0_i32, %c0_i32_0 : i32, i32
  }
  func.func @transform_2(%arg0: i32) -> (i32, i32) {
    %c0_i32 = arith.constant 0 : i32
    %c0_i32_0 = arith.constant 0 : i32
    %c0_i32_1 = arith.constant 0 : i32
    return %c0_i32, %c0_i32_0 : i32, i32
  }
  func.func @transform_3(%arg0: i32) -> (i32, i32, i32) {
    %c0_i32 = arith.constant 0 : i32
    %c0_i32_0 = arith.constant 0 : i32
    %c0_i32_1 = arith.constant 0 : i32
    %c0_i32_2 = arith.constant 0 : i32
    return %c0_i32, %c0_i32_0, %c0_i32_1 : i32, i32, i32
  }
  func.func @transform_4(%arg0: i32) -> (i32, i32) {
    %c0_i32 = arith.constant 0 : i32
    %c0_i32_0 = arith.constant 0 : i32
    %c0_i32_1 = arith.constant 0 : i32
    return %c0_i32, %c0_i32_0 : i32, i32
  }
  func.func @transform_5(%arg0: i32) -> (i32, i32, i32) {
    %c0_i32 = arith.constant 0 : i32
    %c0_i32_0 = arith.constant 0 : i32
    %c0_i32_1 = arith.constant 0 : i32
    %c0_i32_2 = arith.constant 0 : i32
    return %c0_i32, %c0_i32_0, %c0_i32_1 : i32, i32, i32
  }
  func.func @transform_6(%arg0: i32) -> (i32, i32) {
    %c0_i32 = arith.constant 0 : i32
    %c0_i32_0 = arith.constant 0 : i32
    %c0_i32_1 = arith.constant 0 : i32
    return %c0_i32, %c0_i32_0 : i32, i32
  }
  func.func @transform_7(%arg0: i32) -> (i32, i32) {
    %c0_i32 = arith.constant 0 : i32
    %c0_i32_0 = arith.constant 0 : i32
    return %arg0, %c0_i32 : i32, i32
  }
}

</mosaic_0001>

<bundles_post_ra>
// kernel: mlp_list_forward.1
= control target key start
LH: loop header
LB: loop body
LE: loop exit
PB: predicated region body
PF: predicated region fallthrough
CT: control target
= control target key end

     0   :  { %vm51_vm0 = vcmask 1043456   ;;  %v794_v1 = vmov 0   ;;  %v795_v3 = vmov 0.0   ;;  %vm47_vm1 = vcmask 64512   ;;  %s797_s29 = smov 120   ;;  %s798_s24 = smov 8   ;;  %s1005_s1 = inlined_call_operand.vmem [shape: bf16[8,256], index: 1, kind: input, shape index: {}]   ;;  %s1006_s0 = inlined_call_operand.vmem [shape: f32[8,8], index: 0, kind: input, shape index: {}]   ;;  %s1007_s3 = inlined_call_operand.vmem [shape: bf16[2,128,128], index: 3, kind: input, shape index: {}]   ;;  %s1008_s5 = inlined_call_operand.vmem [shape: bf16[2,128,8], index: 5, kind: input, shape index: {}]   ;;  %s1009_s2 = inlined_call_operand.vmem [shape: f32[1,256], index: 2, kind: input, shape index: {}]   ;;  %s1010_s6 = inlined_call_operand.vmem [shape: f32[1,128], index: 6, kind: input, shape index: {}]   ;;  %s1011_s4 = inlined_call_operand.vmem [shape: f32[1,256], index: 4, kind: input, shape index: {}]   ;;  %s1012_s7 = inlined_call_operand.vmem [shape: f32[8,128], index: 7, kind: output, shape index: {}]  }
   0x1   :  { %v29_v0 = vld [vmem:[%s1005_s1] sm:$0xff]  ;;  %90 = vmatprep.mubr.bf16.mxu0 %v794_v1  ;;  %675 = vmatprep.subr.bf16.mxu1 %v795_v3  ;;  %v762_v6 = vld [vmem:[%s1007_s3 + $0x38] sm:$0xff]   ;;  %v763_v9 = vld [vmem:[%s1007_s3 + $0x30] sm:$0xff]   ;;  %vm796_vm2 = vmmov 0   ;;  %v32_v23 = vlaneseq  ;;  %101 = vst [vmem:[%s1012_s7] sm:$0xff] %v795_v3  ;;  %vm561_vm3 = vcmask 130112  }
   0x2   :  { %v27_v2 = vld [vmem:[%s1006_s0] sm:$0xff]  ;;  %v568_v4 = vcombine.high %v29_v0, %v29_v0  ;;  %v567_v5 = vcombine.low %v29_v0, %v29_v0  ;;  %676 = vmatpush3.bf16.msra.mxu1 %v762_v6  ;;  %v764_v10 = vld [vmem:[%s1007_s3 + $0x28] sm:$0xff]   ;;  %v766_v12 = vld [vmem:[%s1007_s3 + $0x18] sm:$0xff]   ;;  %691 = vmatprep.mubr.msk.bf16.mxu1 %vm796_vm2, %v795_v3 }
   0x3   :  { %v28_v8 = vpack.c.bf16 %v27_v2, %v27_v2  ;;  %677 = vmatprep.subr.bf16.mxu1 %v795_v3  ;;  %v765_v11 = vld [vmem:[%s1007_s3 + $0x20] sm:$0xff]   ;;  %v767_v13 = vld [vmem:[%s1007_s3 + $0x10] sm:$0xff]   ;;  %v768_v14 = vld [vmem:[%s1007_s3 + $0x8] sm:$0xff]   ;;  %v33_v24 = vshrl.u32 %v32_v23, 7 }
   0x4   :  { %569 = vmatprep.subr.msk.bf16.mxu0 %vm51_vm0, %v568_v4  ;;  %v53_v7 = vsel %vm51_vm0, %v567_v5, 0  ;;  %v769_v15 = vld [vmem:[%s1007_s3] sm:$0xff]   ;;  %v778_v16 = vld [vmem:[%s1008_s5 + $0x38] sm:$0xff]   ;;  %v779_v17 = vld [vmem:[%s1008_s5 + $0x30] sm:$0xff]  }
   0x5   :  { %73 = vmatpush1.bf16.msra.mxu0 %v53_v7  ;;  %v780_v18 = vld [vmem:[%s1008_s5 + $0x28] sm:$0xff]   ;;  %v781_v19 = vld [vmem:[%s1008_s5 + $0x20] sm:$0xff]   ;;  %v782_v20 = vld [vmem:[%s1008_s5 + $0x18] sm:$0xff]   ;;  %v34_v25 = vsub.s32 0, %v33_v24  ;;  %v38_v40 = vsub.s32 1, %v33_v24 }
   0x6   :  { %695 = vmatprep.subr.bf16.mxu0 %v795_v3  ;;  %678 = vmatpush3.bf16.msra.mxu1 %v763_v9  ;;  %v783_v21 = vld [vmem:[%s1008_s5 + $0x10] sm:$0xff]   ;;  %v784_v22 = vld [vmem:[%s1008_s5 + $0x8] sm:$0xff]   ;;  %v30_v26 = vld [vmem:[%s1009_s2] sm:$0x3] }
   0x7   :  { %679 = vmatprep.subr.bf16.mxu1 %v795_v3  ;;  %v35_v27 = vrot.slane %v30_v26, %v34_v25  ;;  %v770_v33 = vld [vmem:[%s1007_s3 + $0x78] sm:$0xff]   ;;  %v771_v36 = vld [vmem:[%s1007_s3 + $0x70] sm:$0xff]   ;;  %v772_v37 = vld [vmem:[%s1007_s3 + $0x68] sm:$0xff]   ;;  %v39_v42 = vrot.slane %v30_v26, %v38_v40 }
   0x8   :  { %570 = vmatmul.mubr.msk.bf16.vlgmr.msra.gmra.mxu0 %vm47_vm1, %v28_v8  ;;  %v773_v38 = vld [vmem:[%s1007_s3 + $0x60] sm:$0xff]   ;;  %v774_v39 = vld [vmem:[%s1007_s3 + $0x58] sm:$0xff]   ;;  %v775_v41 = vld [vmem:[%s1007_s3 + $0x50] sm:$0xff]  }
   0x9   :  { %711 = vmatprep.mubr.msk.bf16.mxu0 %vm796_vm2, %v795_v3  ;;  %696 = vmatpush3.bf16.msra.mxu0 %v778_v16  ;;  %v776_v43 = vld [vmem:[%s1007_s3 + $0x48] sm:$0xff]   ;;  %v777_v45 = vld [vmem:[%s1007_s3 + $0x40] sm:$0xff]   ;;  %v786_v56 = vld [vmem:[%s1008_s5 + $0x78] sm:$0xff]  }
   0xa   :  { %680 = vmatpush3.bf16.msra.mxu1 %v764_v10  ;;  %697 = vmatprep.subr.bf16.mxu0 %v795_v3  ;;  %v785_v48 = vld [vmem:[%s1008_s5] sm:$0xff]   ;;  %v787_v59 = vld [vmem:[%s1008_s5 + $0x70] sm:$0xff]   ;;  %v788_v60 = vld [vmem:[%s1008_s5 + $0x68] sm:$0xff]  }
   0xb   :  { %681 = vmatprep.subr.bf16.mxu1 %v795_v3  ;;  %v630_v49 = vld [vmem:[%s1010_s6] ss:$0 sm:$0xff]  ;;  %v790_v62 = vld [vmem:[%s1008_s5 + $0x58] sm:$0xff]   ;;  %v791_v63 = vld [vmem:[%s1008_s5 + $0x50] sm:$0xff]  }
   0xc   :  { %514 = vrot.lane.b32.xlu0 %v630_v49, %s797_s29  ;;  %v571_v50 = vld [vmem:[%s1011_s4] ss:$0 sm:$0xff]  ;;  %v792_v0 = vld [vmem:[%s1008_s5 + $0x48] sm:$0xff]   ;;  %v605_v1 = vld [vmem:[%s1011_s4 + $0x1] ss:$0 sm:$0xff] }
   0xd   :  { %698 = vmatpush3.bf16.msra.mxu0 %v779_v17  ;;  %v789_v61 = vld [vmem:[%s1008_s5 + $0x60] sm:$0xff]  }
   0xe   :  { %682 = vmatpush3.bf16.msra.mxu1 %v765_v11  ;;  %699 = vmatprep.subr.bf16.mxu0 %v795_v3  ;;  %v793_v4 = vld [vmem:[%s1008_s5 + $0x40] sm:$0xff]  }
   0xf   :  { %683 = vmatprep.subr.bf16.mxu1 %v795_v3 }
  0x11   :  { %700 = vmatpush3.bf16.msra.mxu0 %v780_v18 }
  0x12   :  { %684 = vmatpush3.bf16.msra.mxu1 %v766_v12  ;;  %701 = vmatprep.subr.bf16.mxu0 %v795_v3 }
  0x13   :  { %685 = vmatprep.subr.bf16.mxu1 %v795_v3 }
  0x15   :  { %702 = vmatpush3.bf16.msra.mxu0 %v781_v19 }
  0x16   :  { %686 = vmatpush3.bf16.msra.mxu1 %v767_v13  ;;  %703 = vmatprep.subr.bf16.mxu0 %v795_v3 }
  0x17   :  { %687 = vmatprep.subr.bf16.mxu1 %v795_v3 }
  0x19   :  { %704 = vmatpush3.bf16.msra.mxu0 %v782_v20 }
  0x1a   :  { %688 = vmatpush3.bf16.msra.mxu1 %v768_v14  ;;  %705 = vmatprep.subr.bf16.mxu0 %v795_v3 }
  0x1b   :  { %689 = vmatprep.subr.bf16.mxu1 %v795_v3 }
  0x1d   :  { %706 = vmatpush3.bf16.msra.mxu0 %v783_v21 }
  0x1e   :  { %690 = vmatpush3.bf16.msra.mxu1 %v769_v15  ;;  %707 = vmatprep.subr.bf16.mxu0 %v795_v3 }
  0x1f   :  { %715 = vmatprep.subr.bf16.mxu1 %v795_v3 }
  0x21   :  { %708 = vmatpush3.bf16.msra.mxu0 %v784_v22 }
  0x22   :  { %709 = vmatprep.subr.bf16.mxu0 %v795_v3 }
  0x25   :  { %710 = vmatpush3.bf16.msra.mxu0 %v785_v48 }
  0x26   :  { %735 = vmatprep.subr.bf16.mxu0 %v795_v3 }
  0x7e   :  { %v515_v16 = vpop.permute.xlu0 %514 }
  0xc8   :  { %v92_v28 = vpop.f32.mrf.mxu0 }
  0xc9   :  { %v93_v29 = vadd.f32 %v92_v28, %v35_v27 }
  0xca   :  { %v94_v30 = vpop.f32.mrf.mxu0 }
  0xcb   :  { %v99_v31 = vmax.f32 %v93_v29, 0.0  ;;  %v95_v44 = vadd.f32 %v94_v30, %v39_v42 }
  0xcc   :  { %v96_v32 = vpop.f32.mrf.mxu0 }
  0xcd   :  { %v102_v34 = vpack.c.bf16 %v99_v31, %v99_v31  ;;  %v100_v46 = vmax.f32 %v95_v44, 0.0 }
  0xce   :  { %v97_v35 = vpop.f32.mrf.mxu0 }
  0xcf   :  { %692 = vmatmul.mubr.bf16.vlgmr.msra.gmra.mxu1 %v102_v34  ;;  %v328_v47 = vpack.c.bf16 %v100_v46, %v100_v46 }
  0xd0   :  { %716 = vmatpush3.bf16.msra.mxu1 %v770_v33  ;;  %731 = vmatprep.mubr.msk.bf16.mxu1 %vm796_vm2, %v795_v3 }
  0xd1   :  { %717 = vmatprep.subr.bf16.mxu1 %v795_v3 }
  0xd4   :  { %718 = vmatpush3.bf16.msra.mxu1 %v771_v36 }
  0xd5   :  { %719 = vmatprep.subr.bf16.mxu1 %v795_v3 }
  0xd8   :  { %720 = vmatpush3.bf16.msra.mxu1 %v772_v37 }
  0xd9   :  { %721 = vmatprep.subr.bf16.mxu1 %v795_v3 }
  0xdc   :  { %722 = vmatpush3.bf16.msra.mxu1 %v773_v38 }
  0xdd   :  { %723 = vmatprep.subr.bf16.mxu1 %v795_v3 }
  0xe0   :  { %724 = vmatpush3.bf16.msra.mxu1 %v774_v39 }
  0xe1   :  { %725 = vmatprep.subr.bf16.mxu1 %v795_v3 }
  0xe4   :  { %726 = vmatpush3.bf16.msra.mxu1 %v775_v41 }
  0xe5   :  { %727 = vmatprep.subr.bf16.mxu1 %v795_v3 }
  0xe8   :  { %728 = vmatpush3.bf16.msra.mxu1 %v776_v43 }
  0xe9   :  { %729 = vmatprep.subr.bf16.mxu1 %v795_v3 }
  0xec   :  { %730 = vmatpush3.bf16.msra.mxu1 %v777_v45 }
  0xef   :  { %732 = vmatmul.mubr.bf16.vlgmr.msra.gmra.mxu1 %v328_v47 }
 0x18f   :  { %v208_v51 = vpop.f32.mrf.mxu1 }
 0x190   :  { %v209_v52 = vadd.f32 %v571_v50, %v208_v51 }
 0x191   :  { %v693_v53 = vpop.f32.mrf.mxu1 }
 0x192   :  { %v214_v54 = vmax.f32 %v209_v52, 0.0 }
 0x193   :  { %v211_v55 = vpop.f32.mrf.mxu1 }
 0x194   :  { %v215_v57 = vpack.c.bf16 %v214_v54, %v214_v54 }
 0x195   :  { %v694_v58 = vpop.f32.mrf.mxu1 }
 0x196   :  { %712 = vmatmul.mubr.bf16.vlgmr.msra.gmra.mxu0 %v215_v57 }
 0x197   :  { %736 = vmatpush3.bf16.msra.mxu0 %v786_v56  ;;  %751 = vmatprep.mubr.msk.bf16.mxu0 %vm796_vm2, %v795_v3 }
 0x198   :  { %737 = vmatprep.subr.bf16.mxu0 %v795_v3 }
 0x19b   :  { %738 = vmatpush3.bf16.msra.mxu0 %v787_v59 }
 0x19c   :  { %739 = vmatprep.subr.bf16.mxu0 %v795_v3 }
 0x19f   :  { %740 = vmatpush3.bf16.msra.mxu0 %v788_v60 }
 0x1a0   :  { %741 = vmatprep.subr.bf16.mxu0 %v795_v3 }
 0x1a3   :  { %742 = vmatpush3.bf16.msra.mxu0 %v789_v61 }
 0x1a4   :  { %743 = vmatprep.subr.bf16.mxu0 %v795_v3 }
 0x1a7   :  { %744 = vmatpush3.bf16.msra.mxu0 %v790_v62 }
 0x1a8   :  { %745 = vmatprep.subr.bf16.mxu0 %v795_v3 }
 0x1ab   :  { %746 = vmatpush3.bf16.msra.mxu0 %v791_v63 }
 0x1ac   :  { %747 = vmatprep.subr.bf16.mxu0 %v795_v3 }
 0x1af   :  { %v435_v2 = vpop.f32.mrf.mxu1  ;;  %748 = vmatpush3.bf16.msra.mxu0 %v792_v0 }
 0x1b0   :  { %v436_v5 = vadd.f32 %v605_v1, %v435_v2  ;;  %749 = vmatprep.subr.bf16.mxu0 %v795_v3 }
 0x1b1   :  { %v733_v6 = vpop.f32.mrf.mxu1 }
 0x1b2   :  { %v441_v7 = vmax.f32 %v436_v5, 0.0 }
 0x1b3   :  { %v438_v8 = vpop.f32.mrf.mxu1  ;;  %750 = vmatpush3.bf16.msra.mxu0 %v793_v4 }
 0x1b4   :  { %v442_v9 = vpack.c.bf16 %v441_v7, %v441_v7 }
 0x1b5   :  { %v734_v10 = vpop.f32.mrf.mxu1 }
 0x1b6   :  { %752 = vmatmul.mubr.bf16.vlgmr.msra.gmra.mxu0 %v442_v9 }
 0x256   :  { %v321_v11 = vpop.f32.mrf.mxu0 }
 0x257   :  { %v322_v12 = vadd.f32 %v630_v49, %v321_v11 }
 0x258   :  { %v713_v13 = vpop.f32.mrf.mxu0 }
 0x259   :  { %327 = vst.msk [vmem:[%s1012_s7] sm:$0xff] %vm47_vm1, %v322_v12 }
 0x25a   :  { %v324_v14 = vpop.f32.mrf.mxu0 }
 0x25c   :  { %v714_v15 = vpop.f32.mrf.mxu0 }
 0x276   :  { %v551_v17 = vpop.f32.mrf.mxu0 }
 0x277   :  { %v552_v18 = vadd.f32 %v551_v17, %v515_v16 }
 0x278   :  { %v753_v19 = vpop.f32.mrf.mxu0 }
 0x279   :  { %558 = vrot.lane.b32.xlu0 %v552_v18, %s798_s24 }
 0x27a   :  { %v554_v20 = vpop.f32.mrf.mxu0 }
 0x27c   :  { %v754_v21 = vpop.f32.mrf.mxu0 }
 0x2eb   :  { %v559_v3 = vpop.permute.xlu0 %558 }
 0x2ec   :  { %562 = vst.msk [vmem:[%s1012_s7] sm:$0xff] %vm561_vm3, %v559_v3 }

</bundles_post_ra>
